<compile_context>
chip_gen: v6e
topology: v6e:2x2x1
jax: 0.10.0
libtpu: 0.0.40
codegen_flags: <defaults>
</compile_context>

<pallas_src>
import functools

import jax
import jax.numpy as jnp
from jax.experimental import pallas as pl
from jax.experimental.pallas import tpu as pltpu


def _multitask_loss_kernel(logits_ref, labels_ref, bbox_ref, cls_ref, loc_ref, *,
                           batch, num_classes, smoothing,
                           tile_b, blocks_per_core, needs_mask):
    step = pl.program_id(1)

    @pl.when(step == 0)
    def _():
        cls_ref[...] = jnp.zeros_like(cls_ref)
        loc_ref[...] = jnp.zeros_like(loc_ref)

    # ---- label-smoothing cross-entropy (batch on the 128-lane axis) ---------
    logits = logits_ref[...].astype(jnp.float32)            # (C, T)
    labels = labels_ref[...]                                 # (1, T) int32
    C, T = logits.shape

    m = jnp.max(logits, axis=0, keepdims=True)               # (1, T)
    shifted = logits - m
    lse = jnp.log(jnp.sum(jnp.exp(shifted), axis=0, keepdims=True))   # (1, T)

    confidence = 1.0 - smoothing
    smooth_val = smoothing / (num_classes - 1) if num_classes > 1 else 0.0

    # per_sample = lse - (conf - sv)*shifted[label] - sv*sum_c shifted[c]
    # (the lse coefficient (conf - sv) + sv*C is exactly 1 -> no extra terms)
    row = jax.lax.broadcasted_iota(jnp.int32, (C, T), 0)
    picked = jnp.sum(jnp.where(row == labels, shifted, 0.0), axis=0, keepdims=True)
    sum_shifted = jnp.sum(shifted, axis=0, keepdims=True)
    per_sample = lse - (confidence - smooth_val) * picked - smooth_val * sum_shifted

    # ---- SmoothL1 (beta = 1.0); pred rows 0:4, target rows 4:8 --------------
    bb = bbox_ref[...].astype(jnp.float32)                   # (8, T)
    d = bb[0:4, :] - bb[4:8, :]
    ad = jnp.abs(d)
    loc_row = jnp.sum(jnp.where(ad < 1.0, 0.5 * d * d, ad - 0.5),
                      axis=0, keepdims=True)                 # (1, T)

    if needs_mask:
        col0 = (pl.program_id(0) * blocks_per_core + step) * tile_b
        col = col0 + jax.lax.broadcasted_iota(jnp.int32, (1, T), 1)
        valid = col < batch
        per_sample = jnp.where(valid, per_sample, 0.0)
        loc_row = jnp.where(valid, loc_row, 0.0)

    # Lane-shaped accumulation; output blocks stay VMEM-resident along the
    # "arbitrary" axis (constant block index).  Final reduce/scale in wrapper.
    cls_ref[...] += per_sample
    loc_ref[...] += loc_row


def _num_tensorcores():
    # Only v7x-like chips expose 2 TensorCores worth sharding the grid over.
    # TODO(synk): switch to pltpu.get_tpu_info() once a core-count field is stable.
    try:
        kind = jax.devices()[0].device_kind.lower()
        if "v7" in kind:
            return 2
    except Exception:
        pass
    return 1


def multitask_loss(class_logits, bbox_pred, class_labels, bbox_labels, *,
                   num_classes, lambda_loc=1.0, smoothing=0.0):
    """Pallas equivalent of MultiTaskLoss.forward. Returns a scalar f32."""
    B, C = class_logits.shape
    assert C == num_classes

    # Split the batch across TensorCores first (v7x only), then tile each half.
    n_cores = _num_tensorcores()
    n_par = n_cores if (n_cores > 1 and B >= 256) else 1
    per_core = -(-B // n_par)

    # Lane budget: double-buffered input blocks <= ~12 MiB (safe against the
    # 32 MiB scoped-VMEM limit on every generation, incl. v7x's 64 MiB physical).
    sub_c = -(-max(C, 1) // 8) * 8
    bytes_per_lane = (sub_c + 8 + 8) * 4             # logits + labels + packed bbox (f32)
    cap = max(128, min(32768,
                       (12 * 1024 * 1024 // (2 * bytes_per_lane)) // 128 * 128))

    if n_par == 1 and per_core <= cap:
        # Fast path: one full-extent block per input; no padding, no mask.
        tile_b, bpc = B, 1
    else:
        tile_b = min(cap, -(-per_core // 128) * 128)
        bpc = -(-per_core // tile_b)
    b_pad = n_par * bpc * tile_b
    pad = b_pad - B
    needs_mask = pad > 0

    # Lane-dense layouts (batch on lanes); native dtypes, cast inside the kernel.
    logits_t = class_logits.T                                     # (C, B)
    labels_row = class_labels.astype(jnp.int32).reshape(1, B)     # (1, B)
    bbox_pack = jnp.concatenate([bbox_pred.T, bbox_labels.T], axis=0)   # (8, B)
    if pad:
        logits_t = jnp.pad(logits_t, ((0, 0), (0, pad)))
        labels_row = jnp.pad(labels_row, ((0, 0), (0, pad)))
        bbox_pack = jnp.pad(bbox_pack, ((0, 0), (0, pad)))

    kernel = functools.partial(
        _multitask_loss_kernel,
        batch=int(B), num_classes=int(C), smoothing=float(smoothing),
        tile_b=int(tile_b), blocks_per_core=int(bpc), needs_mask=bool(needs_mask),
    )

    col_map = lambda c, i, _bpc=bpc: (0, c * _bpc + i)
    out_map = lambda c, i: (c, 0, 0)

    cls_out, loc_out = pl.pallas_call(
        kernel,
        out_shape=(jax.ShapeDtypeStruct((n_par, 1, tile_b), jnp.float32),
                   jax.ShapeDtypeStruct((n_par, 1, tile_b), jnp.float32)),
        grid_spec=pltpu.PrefetchScalarGridSpec(
            num_scalar_prefetch=0,
            grid=(n_par, bpc),
            in_specs=[
                pl.BlockSpec((C, tile_b), col_map),   # logits       (C, B_pad)
                pl.BlockSpec((1, tile_b), col_map),   # labels       (1, B_pad)
                pl.BlockSpec((8, tile_b), col_map),   # bbox pred+tgt (8, B_pad)
            ],
            out_specs=[
                pl.BlockSpec((None, 1, tile_b), out_map),   # cls partials per core
                pl.BlockSpec((None, 1, tile_b), out_map),   # loc partials per core
            ],
        ),
        compiler_params=pltpu.CompilerParams(
            dimension_semantics=("parallel", "arbitrary"),
            vmem_limit_bytes=32 * 1024 * 1024,
        ),
    )(logits_t, labels_row, bbox_pack)

    inv_b = 1.0 / B
    inv_4b = 1.0 / (4.0 * B)
    return jnp.sum(cls_out) * inv_b + lambda_loc * jnp.sum(loc_out) * inv_4b


def _reference(class_logits, bbox_pred, class_labels, bbox_labels,
               *, num_classes, lambda_loc, smoothing):
    log_probs = jax.nn.log_softmax(class_logits.astype(jnp.float32), axis=-1)
    confidence = 1.0 - smoothing
    true_dist = jnp.full_like(log_probs, smoothing / (num_classes - 1))
    true_dist = true_dist.at[jnp.arange(class_logits.shape[0]), class_labels].set(confidence)
    cls_loss = jnp.mean(jnp.sum(-true_dist * log_probs, axis=-1))
    d = bbox_pred.astype(jnp.float32) - bbox_labels.astype(jnp.float32)
    ad = jnp.abs(d)
    loc_loss = jnp.mean(jnp.where(ad < 1.0, 0.5 * d * d, ad - 0.5))
    return cls_loss + lambda_loc * loc_loss


if __name__ == "__main__":
    key = jax.random.PRNGKey(0)
    k1, k2, k3, k4 = jax.random.split(key, 4)

    B = 8
    NUM_CLASSES = 10
    LAMBDA_LOC = 1.0
    SMOOTHING = 0.1

    class_logits = jax.random.normal(k1, (B, NUM_CLASSES), dtype=jnp.float32)
    bbox_pred = jax.random.normal(k2, (B, 4), dtype=jnp.float32)
    class_labels = jax.random.randint(k3, (B,), 0, NUM_CLASSES, dtype=jnp.int32)
    bbox_labels = jax.random.normal(k4, (B, 4), dtype=jnp.float32)

    loss = multitask_loss(
        class_logits, bbox_pred, class_labels, bbox_labels,
        num_classes=NUM_CLASSES, lambda_loc=LAMBDA_LOC, smoothing=SMOOTHING,
    )
    loss = jax.block_until_ready(loss)

    ref = _reference(
        class_logits, bbox_pred, class_labels, bbox_labels,
        num_classes=NUM_CLASSES, lambda_loc=LAMBDA_LOC, smoothing=SMOOTHING,
    )
    assert jnp.allclose(loss, ref, rtol=1e-5, atol=1e-5), (loss, ref)
    print("KERNEL_OK")
</pallas_src>

<mosaic_0001>
module attributes {stable_mosaic.version = 11 : i64} {
  func.func @_multitask_loss_kernel(%arg0: i32, %arg1: i32, %arg2: memref<10x8xf32, #tpu.memory_space<vmem>>, %arg3: memref<1x8xi32, #tpu.memory_space<vmem>>, %arg4: memref<8x8xf32, #tpu.memory_space<vmem>>, %arg5: memref<1x1x8xf32, #tpu.memory_space<vmem>>, %arg6: memref<1x1x8xf32, #tpu.memory_space<vmem>>) attributes {dimension_semantics = [#tpu.dimension_semantics<parallel>, #tpu.dimension_semantics<arbitrary>], iteration_bounds = array<i64: 1, 1>, scalar_prefetch = 0 : i64, scratch_operands = 0 : i64, tpu.core_type = #tpu.core_type<tc>, window_params = [{transform_indices = @transform_0, window_bounds = array<i64: 10, 8>}, {transform_indices = @transform_1, window_bounds = array<i64: 1, 8>}, {transform_indices = @transform_2, window_bounds = array<i64: 8, 8>}, {transform_indices = @transform_3, window_bounds = array<i64: 1, 1, 8>}, {transform_indices = @transform_4, window_bounds = array<i64: 1, 1, 8>}]} {
    %c0_i32 = arith.constant 0 : i32
    %0 = arith.cmpi eq, %arg1, %c0_i32 : i32
    %1 = arith.extui %0 : i1 to i32
    %c0_i32_0 = arith.constant 0 : i32
    %2 = arith.cmpi ne, %1, %c0_i32_0 : i32
    scf.if %2 {
      %cst_28 = arith.constant 0.000000e+00 : f32
      %55 = vector.broadcast %cst_28 : f32 to vector<1x8xf32>
      %c0_29 = arith.constant 0 : index
      %c0_30 = arith.constant 0 : index
      %c0_31 = arith.constant 0 : index
      %56 = vector.load %arg5[%c0_29, %c0_30, %c0_31] : memref<1x1x8xf32, #tpu.memory_space<vmem>>, vector<1x1x8xf32>
      %57 = vector.shape_cast %56 : vector<1x1x8xf32> to vector<1x8xf32>
      %58 = vector.shape_cast %55 : vector<1x8xf32> to vector<1x1x8xf32>
      tpu.vector_store %arg5[%c0_29, %c0_30, %c0_31], %58 {strides = array<i32>} : memref<1x1x8xf32, #tpu.memory_space<vmem>>, vector<1x1x8xf32>,
      %cst_32 = arith.constant 0.000000e+00 : f32
      %59 = vector.broadcast %cst_32 : f32 to vector<1x8xf32>
      %c0_33 = arith.constant 0 : index
      %c0_34 = arith.constant 0 : index
      %c0_35 = arith.constant 0 : index
      %60 = vector.load %arg6[%c0_33, %c0_34, %c0_35] : memref<1x1x8xf32, #tpu.memory_space<vmem>>, vector<1x1x8xf32>
      %61 = vector.shape_cast %60 : vector<1x1x8xf32> to vector<1x8xf32>
      %62 = vector.shape_cast %59 : vector<1x8xf32> to vector<1x1x8xf32>
      tpu.vector_store %arg6[%c0_33, %c0_34, %c0_35], %62 {strides = array<i32>} : memref<1x1x8xf32, #tpu.memory_space<vmem>>, vector<1x1x8xf32>,
    } else {
    }
    %c0 = arith.constant 0 : index
    %c0_1 = arith.constant 0 : index
    %3 = vector.load %arg2[%c0, %c0_1] : memref<10x8xf32, #tpu.memory_space<vmem>>, vector<10x8xf32>
    %c0_2 = arith.constant 0 : index
    %c0_3 = arith.constant 0 : index
    %4 = vector.load %arg3[%c0_2, %c0_3] : memref<1x8xi32, #tpu.memory_space<vmem>>, vector<1x8xi32>
    %cst = arith.constant dense<0xFF800000> : vector<8xf32>
    %5 = vector.multi_reduction <maximumf>, %3, %cst [0] : vector<10x8xf32> to vector<8xf32>
    %6 = vector.shape_cast %5 : vector<8xf32> to vector<1x8xf32>
    %7 = vector.broadcast %6 : vector<1x8xf32> to vector<10x8xf32>
    %8 = arith.subf %3, %7 : vector<10x8xf32>
    %9 = math.exp %8 : vector<10x8xf32>
    %cst_4 = arith.constant dense<0.000000e+00> : vector<8xf32>
    %10 = vector.multi_reduction <add>, %9, %cst_4 [0] : vector<10x8xf32> to vector<8xf32>
    %11 = vector.shape_cast %10 : vector<8xf32> to vector<1x8xf32>
    %12 = math.log %11 : vector<1x8xf32>
    %13 = tpu.iota {dimensions = array<i32: 0>} : vector<10x8xi32>
    %14 = vector.broadcast %4 : vector<1x8xi32> to vector<10x8xi32>
    %15 = arith.cmpi eq, %13, %14 : vector<10x8xi32>
    %cst_5 = arith.constant 0.000000e+00 : f32
    %16 = vector.broadcast %cst_5 : f32 to vector<10x8xf32>
    %17 = arith.select %15, %8, %16 : vector<10x8xi1>, vector<10x8xf32>
    %cst_6 = arith.constant dense<0.000000e+00> : vector<8xf32>
    %18 = vector.multi_reduction <add>, %17, %cst_6 [0] : vector<10x8xf32> to vector<8xf32>
    %19 = vector.shape_cast %18 : vector<8xf32> to vector<1x8xf32>
    %cst_7 = arith.constant dense<0.000000e+00> : vector<8xf32>
    %20 = vector.multi_reduction <add>, %8, %cst_7 [0] : vector<10x8xf32> to vector<8xf32>
    %21 = vector.shape_cast %20 : vector<8xf32> to vector<1x8xf32>
    %cst_8 = arith.constant 0.888888895 : f32
    %22 = vector.broadcast %cst_8 : f32 to vector<1x8xf32>
    %23 = arith.mulf %22, %19 : vector<1x8xf32>
    %24 = arith.subf %12, %23 : vector<1x8xf32>
    %cst_9 = arith.constant 0.0111111114 : f32
    %25 = vector.broadcast %cst_9 : f32 to vector<1x8xf32>
    %26 = arith.mulf %25, %21 : vector<1x8xf32>
    %27 = arith.subf %24, %26 : vector<1x8xf32>
    %c0_10 = arith.constant 0 : index
    %c0_11 = arith.constant 0 : index
    %28 = vector.load %arg4[%c0_10, %c0_11] : memref<8x8xf32, #tpu.memory_space<vmem>>, vector<8x8xf32>
    %29 = vector.extract_strided_slice %28 {offsets = [0, 0], sizes = [4, 8], strides = [1, 1]} : vector<8x8xf32> to vector<4x8xf32>
    %30 = vector.extract_strided_slice %28 {offsets = [4, 0], sizes = [4, 8], strides = [1, 1]} : vector<8x8xf32> to vector<4x8xf32>
    %31 = arith.subf %29, %30 : vector<4x8xf32>
    %32 = math.absf %31 : vector<4x8xf32>
    %cst_12 = arith.constant 1.000000e+00 : f32
    %33 = vector.broadcast %cst_12 : f32 to vector<4x8xf32>
    %34 = arith.cmpf olt, %32, %33 : vector<4x8xf32>
    %cst_13 = arith.constant 5.000000e-01 : f32
    %35 = vector.broadcast %cst_13 : f32 to vector<4x8xf32>
    %36 = arith.mulf %35, %31 : vector<4x8xf32>
    %37 = arith.mulf %36, %31 : vector<4x8xf32>
    %cst_14 = arith.constant 5.000000e-01 : f32
    %38 = vector.broadcast %cst_14 : f32 to vector<4x8xf32>
    %39 = arith.subf %32, %38 : vector<4x8xf32>
    %40 = arith.select %34, %37, %39 : vector<4x8xi1>, vector<4x8xf32>
    %cst_15 = arith.constant dense<0.000000e+00> : vector<8xf32>
    %41 = vector.multi_reduction <add>, %40, %cst_15 [0] : vector<4x8xf32> to vector<8xf32>
    %42 = vector.shape_cast %41 : vector<8xf32> to vector<1x8xf32>
    %c0_16 = arith.constant 0 : index
    %c0_17 = arith.constant 0 : index
    %c0_18 = arith.constant 0 : index
    %43 = vector.load %arg5[%c0_16, %c0_17, %c0_18] : memref<1x1x8xf32, #tpu.memory_space<vmem>>, vector<1x1x8xf32>
    %44 = vector.shape_cast %43 : vector<1x1x8xf32> to vector<1x8xf32>
    %45 = arith.addf %44, %27 : vector<1x8xf32>
    %c0_19 = arith.constant 0 : index
    %c0_20 = arith.constant 0 : index
    %c0_21 = arith.constant 0 : index
    %46 = vector.load %arg5[%c0_19, %c0_20, %c0_21] : memref<1x1x8xf32, #tpu.memory_space<vmem>>, vector<1x1x8xf32>
    %47 = vector.shape_cast %46 : vector<1x1x8xf32> to vector<1x8xf32>
    %48 = vector.shape_cast %45 : vector<1x8xf32> to vector<1x1x8xf32>
    tpu.vector_store %arg5[%c0_19, %c0_20, %c0_21], %48 {strides = array<i32>} : memref<1x1x8xf32, #tpu.memory_space<vmem>>, vector<1x1x8xf32>,
    %c0_22 = arith.constant 0 : index
    %c0_23 = arith.constant 0 : index
    %c0_24 = arith.constant 0 : index
    %49 = vector.load %arg6[%c0_22, %c0_23, %c0_24] : memref<1x1x8xf32, #tpu.memory_space<vmem>>, vector<1x1x8xf32>
    %50 = vector.shape_cast %49 : vector<1x1x8xf32> to vector<1x8xf32>
    %51 = arith.addf %50, %42 : vector<1x8xf32>
    %c0_25 = arith.constant 0 : index
    %c0_26 = arith.constant 0 : index
    %c0_27 = arith.constant 0 : index
    %52 = vector.load %arg6[%c0_25, %c0_26, %c0_27] : memref<1x1x8xf32, #tpu.memory_space<vmem>>, vector<1x1x8xf32>
    %53 = vector.shape_cast %52 : vector<1x1x8xf32> to vector<1x8xf32>
    %54 = vector.shape_cast %51 : vector<1x8xf32> to vector<1x1x8xf32>
    tpu.vector_store %arg6[%c0_25, %c0_26, %c0_27], %54 {strides = array<i32>} : memref<1x1x8xf32, #tpu.memory_space<vmem>>, vector<1x1x8xf32>,
    return
  }
  func.func @transform_0(%arg0: i32, %arg1: i32) -> (i32, i32) {
    %c1_i32 = arith.constant 1 : i32
    %0 = arith.muli %arg0, %c1_i32 : i32
    %1 = arith.addi %0, %arg1 : i32
    %c0_i32 = arith.constant 0 : i32
    %c0_i32_0 = arith.constant 0 : i32
    return %c0_i32, %1 : i32, i32
  }
  func.func @transform_1(%arg0: i32, %arg1: i32) -> (i32, i32) {
    %c1_i32 = arith.constant 1 : i32
    %0 = arith.muli %arg0, %c1_i32 : i32
    %1 = arith.addi %0, %arg1 : i32
    %c0_i32 = arith.constant 0 : i32
    %c0_i32_0 = arith.constant 0 : i32
    return %c0_i32, %1 : i32, i32
  }
  func.func @transform_2(%arg0: i32, %arg1: i32) -> (i32, i32) {
    %c1_i32 = arith.constant 1 : i32
    %0 = arith.muli %arg0, %c1_i32 : i32
    %1 = arith.addi %0, %arg1 : i32
    %c0_i32 = arith.constant 0 : i32
    %c0_i32_0 = arith.constant 0 : i32
    return %c0_i32, %1 : i32, i32
  }
  func.func @transform_3(%arg0: i32, %arg1: i32) -> (i32, i32, i32) {
    %c0_i32 = arith.constant 0 : i32
    %c0_i32_0 = arith.constant 0 : i32
    %c0_i32_1 = arith.constant 0 : i32
    return %arg0, %c0_i32, %c0_i32_0 : i32, i32, i32
  }
  func.func @transform_4(%arg0: i32, %arg1: i32) -> (i32, i32, i32) {
    %c0_i32 = arith.constant 0 : i32
    %c0_i32_0 = arith.constant 0 : i32
    %c0_i32_1 = arith.constant 0 : i32
    return %arg0, %c0_i32, %c0_i32_0 : i32, i32, i32
  }
}

</mosaic_0001>

<bundles_post_ra>
// kernel: tpu_custom_call.1
= control target key start
LH: loop header
LB: loop body
LE: loop exit
PB: predicated region body
PF: predicated region fallthrough
CT: control target
= control target key end

     0   :  { %10 = vsyncpa [#allocation3], 0  ;;  %vm70_vm0 = vcmask 57344   ;;  %vm76_vm1 = vcmask 64512   ;;  %v261_v2 = vmov 0.0   ;;  %vm78_vm2 = vcmask 58368   ;;  %s319_s0 = inlined_call_operand.vmem [shape: f32[10,8], index: 0, kind: input, shape index: {}]   ;;  %s320_s1 = inlined_call_operand.vmem [shape: s32[1,8], index: 1, kind: input, shape index: {}]   ;;  %s321_s2 = inlined_call_operand.vmem [shape: f32[8,8], index: 2, kind: input, shape index: {}]   ;;  %s322_s3 = inlined_call_operand.hbm [shape: f32[1,1,8], index: 3, kind: output, shape index: {0}]   ;;  %s323_s4 = inlined_call_operand.hbm [shape: f32[1,1,8], index: 4, kind: output, shape index: {1}]  }
   0x1   :  { %v73_v0 = vld [vmem:[%s319_s0] sm:$0xff]  ;;  %v74_v1 = vld [vmem:[%s319_s0 + $0x8] sm:$0x3]  ;;  %71 = vst.msk [vmem:[#allocation2] sm:$0x1] %vm70_vm0, %v261_v2 }
   0x2   :  { %72 = vst.msk [vmem:[#allocation4] sm:$0x1] %vm70_vm0, %v261_v2  ;;  %v77_v3 = vsel %vm76_vm1, %v73_v0, -inf  ;;  %v137_v4 = vld [vmem:[%s321_s2] sm:$0xff]  ;;  %v79_v5 = vsel %vm78_vm2, %v74_v1, -inf }
   0x3   :  { %v139_v6 = vrot.slane %v137_v4, 4 }
   0x4   :  { %11 = vsyncpa [#allocation5], 0  ;;  %v80_v7 = vmax.f32 %v77_v3, %v79_v5  ;;  %vm148_vm4 = vcmask 60416   ;;  %v104_v21 = vlaneseq  ;;  %s262_s0 = smov [#allocation4]   ;;  %v206_v34 = vld [vmem:[%s320_s1] ss:$0 sm:$0xff] }
   0x5   :  { %v141_v8 = vsub.f32 %v137_v4, %v139_v6  ;;  %s179_s2 = sshll.u32 %s262_s0, 4  ;;  %s180_s2 = int_to_ptr.vmem [resolvable:$true] %s179_s2 }
   0x6   :  { %v81_v9 = vrot.slane %v80_v7, 4  ;;  %v105_v27 = vshrl.u32 %v104_v21, 7  ;;  %s217_s23 = scalar_lea.vmem %s180_s2, 16  ;;  %s221_s24 = scalar_lea.vmem %s180_s2, 32 }
   0x7   :  { %v142_v10 = vand.u32 2147483647, %v141_v8  ;;  %v144_v11 = vmul.f32 0.5, %v141_v8  ;;  %p218_p0 = scmp.ne.s32.totalorder %s180_s2, %s217_s23  ;;  %p222_p1 = scmp.lt.s32.totalorder %s180_s2, %s180_s2 }
   0x8   :  { %v82_v12 = vmax.f32 %v80_v7, %v81_v9  ;;  %v106_v32 = vadd.s32 8, %v105_v27  ;;  %vm111_vm5 = vcmp.eq.s32.totalorder %v105_v27, %v206_v34  ;;  %p223_p2 = scmp.lt.s32.totalorder %s221_s24, %s217_s23 }
   0x9   :  { %vm143_vm3 = vcmp.lt.f32.partialorder %v142_v10, 1.0  ;;  %v145_v13 = vmul.f32 %v144_v11, %v141_v8  ;;  %v207_v14 = vadd.f32 -0.5, %v142_v10  ;;  %v160_v33 = vld [vmem:[#allocation4] sm:$0x1] }
   0xa   :  { %v83_v15 = vrot.slane %v82_v12, 2  ;;  %vm112_vm6 = vcmp.eq.s32.totalorder %v106_v32, %v206_v34  ;;  %p224_p3 = por %p223_p2, %p222_p1 }
   0xb   :  { %v147_v16 = vsel %vm143_vm3, %v145_v13, %v207_v14 }
   0xc   :  { %v84_v17 = vmax.f32 %v82_v12, %v83_v15  ;;  %v149_v18 = vsel %vm148_vm4, %v147_v16, 0.0  ;;  %p225_p4 = pnand %p224_p3, %p218_p0 }
   0xd   :  { %v150_v19 = vrot.slane %v149_v18, 4 }
   0xe   :  { %v85_v20 = vrot.slane %v84_v17, 1 }
   0xf   :  { %v151_v22 = vadd.f32 %v150_v19, %v149_v18 }
  0x10   :  { %v86_v23 = vmax.f32 %v84_v17, %v85_v20 }
  0x11   :  { %v152_v24 = vrot.slane %v151_v22, 2 }
  0x12   :  { %v87_v25 = vsub.f32 %v73_v0, %v86_v23  ;;  %v88_v26 = vsub.f32 %v74_v1, %v86_v23 }
  0x13   :  { %v153_v28 = vadd.f32 %v152_v24, %v151_v22 }
  0x14   :  { %v89_v29 = vmul.f32 1.442695, %v87_v25  ;;  %v91_v30 = vmul.f32 1.442695, %v88_v26 }
  0x15   :  { %v154_v31 = vrot.slane %v153_v28, 1 }
  0x16   :  { %211 = vpow2.f32 %v89_v29 }
  0x17   :  { %213 = vpow2.f32 %v91_v30  ;;  %v155_v35 = vadd.f32 %v154_v31, %v153_v28 }
  0x19   :  { %v161_v36 = vadd.f32 %v160_v33, %v155_v35 }
  0x1b   :  { %162 = vst.msk [vmem:[#allocation4] sm:$0x1] %vm70_vm0, %v161_v36 }
  0x1c   :  { %228 = shalt.err (!%p225_p4)
}
  0x1d   :  { %182 = dma.vmem_to_hbm [thread:$0]  %s180_s2, 16, %s323_s4, [#allocation5]   ;;  %v113_v37 = vsel %vm111_vm5, %v87_v25, 0.0  ;;  %v114_v38 = vsel %vm112_vm6, %v88_v26, 0.0  ;;  %v124_v42 = vsel %vm76_vm1, %v87_v25, 0.0  ;;  %v125_v43 = vsel %vm78_vm2, %v88_v26, 0.0 }
  0x1e   :  { %v115_v39 = vsel %vm76_vm1, %v113_v37, 0.0  ;;  %v116_v40 = vsel %vm78_vm2, %v114_v38, 0.0  ;;  %v126_v49 = vadd.f32 %v125_v43, %v124_v42  ;;  %v156_v9 = vld [vmem:[#allocation2] sm:$0x1]  ;;  %s263_s1 = smov [#allocation2]  }
  0x1f   :  { %v117_v46 = vadd.f32 %v116_v40, %v115_v39  ;;  %s169_s4 = sshll.u32 %s263_s1, 4  ;;  %s170_s4 = int_to_ptr.vmem [resolvable:$true] %s169_s4 }
  0x20   :  { %v127_v53 = vrot.slane %v126_v49, 4  ;;  %s237_s27 = scalar_lea.vmem %s170_s4, 16  ;;  %s241_s28 = scalar_lea.vmem %s170_s4, 32 }
  0x21   :  { %v118_v51 = vrot.slane %v117_v46, 4  ;;  %p238_p5 = scmp.ne.s32.totalorder %s170_s4, %s237_s27  ;;  %p242_p6 = scmp.lt.s32.totalorder %s170_s4, %s170_s4 }
  0x22   :  { %v128_v57 = vadd.f32 %v127_v53, %v126_v49  ;;  %p243_p7 = scmp.lt.s32.totalorder %s241_s28, %s237_s27 }
  0x23   :  { %v212_v41 = vpop.eup %211  ;;  %v119_v55 = vadd.f32 %v118_v51, %v117_v46 }
  0x24   :  { %v214_v44 = vpop.eup %213  ;;  %v93_v45 = vsel %vm76_vm1, %v212_v41, 0.0  ;;  %v129_v61 = vrot.slane %v128_v57, 2  ;;  %p244_p8 = por %p243_p7, %p242_p6 }
  0x25   :  { %v94_v47 = vsel %vm78_vm2, %v214_v44, 0.0  ;;  %v120_v59 = vrot.slane %v119_v55, 2 }
  0x26   :  { %v95_v48 = vadd.f32 %v94_v47, %v93_v45  ;;  %v130_v63 = vadd.f32 %v129_v61, %v128_v57  ;;  %p245_p9 = pnand %p244_p8, %p238_p5 }
  0x27   :  { %v121_v62 = vadd.f32 %v120_v59, %v119_v55 }
  0x28   :  { %v96_v50 = vrot.slane %v95_v48, 4  ;;  %v131_v1 = vrot.slane %v130_v63, 1 }
  0x29   :  { %v122_v0 = vrot.slane %v121_v62, 1 }
  0x2a   :  { %v97_v52 = vadd.f32 %v96_v50, %v95_v48  ;;  %v132_v3 = vadd.f32 %v131_v1, %v130_v63 }
  0x2b   :  { %v123_v2 = vadd.f32 %v122_v0, %v121_v62 }
  0x2c   :  { %v98_v54 = vrot.slane %v97_v52, 2  ;;  %v135_v7 = vmul.f32 0.011111111, %v132_v3 }
  0x2d   :  { %v133_v4 = vmul.f32 0.8888889, %v123_v2 }
  0x2e   :  { %v99_v56 = vadd.f32 %v98_v54, %v97_v52 }
  0x30   :  { %v100_v58 = vrot.slane %v99_v56, 1 }
  0x32   :  { %v101_v60 = vadd.f32 %v100_v58, %v99_v56 }
  0x34   :  { %215 = vlog2.f32 %v101_v60 }
  0x41   :  { %v216_v5 = vpop.eup %215 }
  0x42   :  { %v103_v6 = vmul.f32 0.6931472, %v216_v5 }
  0x44   :  { %v134_v8 = vsub.f32 %v103_v6, %v133_v4 }
  0x46   :  { %v136_v10 = vsub.f32 %v134_v8, %v135_v7 }
  0x48   :  { %v157_v11 = vadd.f32 %v156_v9, %v136_v10 }
  0x4a   :  { %159 = vst.msk [vmem:[#allocation2] sm:$0x1] %vm70_vm0, %v157_v11 }
  0x4b   :  { %248 = shalt.err (!%p245_p9)
}
  0x4c   :  { %172 = dma.vmem_to_hbm [thread:$0]  %s170_s4, 16, %s322_s3, [#allocation3]  }
  0x4d   :  { %257 = dma.done.wait [#allocation3], 16  }
  0x4e   :  { %258 = vsyncadd [#allocation3], 4294967280 }
  0x4f   :  { %259 = dma.done.wait [#allocation5], 16  }
  0x50   :  { %260 = vsyncadd [#allocation5], 4294967280 }
  0x51   :  { %189 = vsyncpa [#allocation3], 1 }
  0x52   :  { %190 = vsyncpa [#allocation5], 1 }

</bundles_post_ra>
